<compile_context>
chip_gen: v6e
topology: v6e:2x2x1
jax: 0.10.0
libtpu: 0.0.40
codegen_flags: <defaults>
</compile_context>

<pallas_src>
import functools

import jax
import jax.numpy as jnp
from jax.experimental import pallas as pl
from jax.experimental.pallas import tpu as pltpu

_LANE = 128     # lane width: last dim of blocks should be a multiple of this
_SUBLANE = 8    # f32 sublane granule: second-to-last dim granule


def _round_up(x, m):
    return ((x + m - 1) // m) * m


def linear_kernel(x_ref, w_ref, b_ref, o_ref):
    # Hot path: one MXU matmul + lane-dense bias add and store.
    x = x_ref[...]                      # [tile_b, K]
    w = w_ref[...]                      # [K, N_pad]
    b = b_ref[...]                      # [1, N_pad]
    acc = jnp.dot(x, w, preferred_element_type=jnp.float32)
    o_ref[...] = (acc + b).astype(o_ref.dtype)


def _pick_tile_b(B):
    """Pick a batch tile: multiple of 8, ~512 rows, >=2 grid steps when B allows."""
    if B <= _SUBLANE:
        return _round_up(max(B, 1), _SUBLANE)
    half = _round_up((B + 1) // 2, _SUBLANE)   # guarantees >= 2 programs
    return min(512, half)


@functools.partial(jax.jit, static_argnames=("tile_b", "force_pallas"))
def simple_nn_forward(x, w, b, *, tile_b=None, force_pallas=False):
    """Forward of SimpleNN: x @ W + b.

    x: [B, input_size]
    w: [input_size, num_classes]   (transposed vs torch nn.Linear.weight)
    b: [num_classes]
    """
    B, K = x.shape
    K2, N = w.shape
    assert K == K2 and b.shape == (N,)

    # Tiny layers are launch-overhead-bound in Pallas; let XLA fuse dot+add.
    if not force_pallas and (B * K * N) < (1 << 20):
        return x @ w + b

    # --- Pad the class dim to a lane-dense multiple of 128 (zero columns). ---
    N_pad = _round_up(N, _LANE)
    if N_pad != N:
        w = jnp.pad(w, ((0, 0), (0, N_pad - N)))
        b = jnp.pad(b, (0, N_pad - N))
    b2d = b.reshape(1, N_pad)

    # --- Pick a batch tile and pad B up to a tile multiple (zero rows). ------
    if tile_b is None:
        tile_b = _pick_tile_b(B)
    tile_b = _round_up(tile_b, _SUBLANE)
    B_pad = _round_up(B, tile_b)
    if B_pad != B:
        x = jnp.pad(x, ((0, B_pad - B), (0, 0)))
    grid_b = B_pad // tile_b

    # --- VMEM budget: resident weight + double-buffered x/out tiles + bias. --
    itemsize = 4  # f32
    vmem_bytes = (K * N_pad * itemsize
                  + 2 * tile_b * K * itemsize
                  + 2 * tile_b * N_pad * itemsize
                  + N_pad * itemsize)
    vmem_limit = min(max(int(vmem_bytes * 1.5) + (1 << 20), 16 << 20), 48 << 20)

    cost = pl.CostEstimate(
        flops=2 * B_pad * K * N_pad,
        transcendentals=0,
        bytes_accessed=itemsize * (B_pad * K + K * N_pad + N_pad + B_pad * N_pad),
    )

    out_padded = pl.pallas_call(
        linear_kernel,
        out_shape=jax.ShapeDtypeStruct((B_pad, N_pad), x.dtype),
        grid_spec=pltpu.PrefetchScalarGridSpec(
            num_scalar_prefetch=0,
            grid=(grid_b,),
            in_specs=[
                pl.BlockSpec((tile_b, K), lambda i: (i, 0)),       # x tile
                pl.BlockSpec((K, N_pad), lambda i: (0, 0)),        # full weight (resident)
                pl.BlockSpec((1, N_pad), lambda i: (0, 0)),        # bias row
            ],
            out_specs=pl.BlockSpec((tile_b, N_pad), lambda i: (i, 0)),
        ),
        compiler_params=pltpu.CompilerParams(
            dimension_semantics=("parallel",),
            vmem_limit_bytes=vmem_limit,
        ),
        cost_estimate=cost,
    )(x, w, b2d)

    # Slice off batch/class padding.
    return out_padded[:B, :N]


if __name__ == "__main__":
    # Small shapes consistent with the module: batch=8, input_size=32, num_classes=8.
    batch, input_size, num_classes = 8, 32, 8

    key = jax.random.PRNGKey(0)
    kx, kw, kb = jax.random.split(key, 3)

    x = jax.random.normal(kx, (batch, input_size), dtype=jnp.float32)
    # Mimic nn.Linear's uniform(-1/sqrt(in), 1/sqrt(in)) init, deterministically.
    bound = 1.0 / jnp.sqrt(jnp.float32(input_size))
    w = jax.random.uniform(kw, (input_size, num_classes), dtype=jnp.float32,
                           minval=-bound, maxval=bound)
    b = jax.random.uniform(kb, (num_classes,), dtype=jnp.float32,
                           minval=-bound, maxval=bound)

    # force_pallas=True so the demo actually exercises the kernel even though
    # these shapes would normally take the plain-XLA fallback.
    out = simple_nn_forward(x, w, b, force_pallas=True)
    out = jax.block_until_ready(out)

    # Reference check in plain JAX.
    ref = x @ w + b
    assert out.shape == (batch, num_classes)
    assert jnp.allclose(out, ref, atol=1e-5, rtol=1e-5)

    print("KERNEL_OK")
</pallas_src>

<mosaic_0001>
module attributes {stable_mosaic.version = 11 : i64} {
  func.func @linear_kernel(%arg0: i32, %arg1: memref<8x32xf32, #tpu.memory_space<vmem>>, %arg2: memref<32x128xf32, #tpu.memory_space<vmem>>, %arg3: memref<1x128xf32, #tpu.memory_space<vmem>>, %arg4: memref<8x128xf32, #tpu.memory_space<vmem>>) attributes {dimension_semantics = [#tpu.dimension_semantics<parallel>], iteration_bounds = array<i64: 1>, scalar_prefetch = 0 : i64, scratch_operands = 0 : i64, tpu.core_type = #tpu.core_type<tc>, window_params = [{transform_indices = @transform_0, window_bounds = array<i64: 8, 32>}, {pipeline_mode = #tpu.pipeline_mode<synchronous>, transform_indices = @transform_1, window_bounds = array<i64: 32, 128>}, {pipeline_mode = #tpu.pipeline_mode<synchronous>, transform_indices = @transform_2, window_bounds = array<i64: 1, 128>}, {transform_indices = @transform_3, window_bounds = array<i64: 8, 128>}]} {
    %c0 = arith.constant 0 : index
    %c0_0 = arith.constant 0 : index
    %0 = vector.load %arg1[%c0, %c0_0] : memref<8x32xf32, #tpu.memory_space<vmem>>, vector<8x32xf32>
    %c0_1 = arith.constant 0 : index
    %c0_2 = arith.constant 0 : index
    %1 = vector.load %arg2[%c0_1, %c0_2] : memref<32x128xf32, #tpu.memory_space<vmem>>, vector<32x128xf32>
    %c0_3 = arith.constant 0 : index
    %c0_4 = arith.constant 0 : index
    %2 = vector.load %arg3[%c0_3, %c0_4] : memref<1x128xf32, #tpu.memory_space<vmem>>, vector<1x128xf32>
    %cst = arith.constant dense<0.000000e+00> : vector<8x128xf32>
    %3 = tpu.matmul %0, %1, %cst {dimension_numbers = #tpu.dot_dimension_numbers<[1], [0], [0], [1], [0, 0, 1, 1], [], []>} : vector<8x32xf32>, vector<32x128xf32>, vector<8x128xf32> -> vector<8x128xf32>
    %4 = vector.broadcast %2 : vector<1x128xf32> to vector<8x128xf32>
    %5 = arith.addf %3, %4 : vector<8x128xf32>
    %c0_5 = arith.constant 0 : index
    %c0_6 = arith.constant 0 : index
    %6 = vector.load %arg4[%c0_5, %c0_6] : memref<8x128xf32, #tpu.memory_space<vmem>>, vector<8x128xf32>
    tpu.vector_store %arg4[%c0_5, %c0_6], %5 {strides = array<i32>} : memref<8x128xf32, #tpu.memory_space<vmem>>, vector<8x128xf32>,
    return
  }
  func.func @transform_0(%arg0: i32) -> (i32, i32) {
    %c0_i32 = arith.constant 0 : i32
    %c0_i32_0 = arith.constant 0 : i32
    return %arg0, %c0_i32 : i32, i32
  }
  func.func @transform_1(%arg0: i32) -> (i32, i32) {
    %c0_i32 = arith.constant 0 : i32
    %c0_i32_0 = arith.constant 0 : i32
    %c0_i32_1 = arith.constant 0 : i32
    return %c0_i32, %c0_i32_0 : i32, i32
  }
  func.func @transform_2(%arg0: i32) -> (i32, i32) {
    %c0_i32 = arith.constant 0 : i32
    %c0_i32_0 = arith.constant 0 : i32
    %c0_i32_1 = arith.constant 0 : i32
    return %c0_i32, %c0_i32_0 : i32, i32
  }
  func.func @transform_3(%arg0: i32) -> (i32, i32) {
    %c0_i32 = arith.constant 0 : i32
    %c0_i32_0 = arith.constant 0 : i32
    return %arg0, %c0_i32 : i32, i32
  }
}

</mosaic_0001>

<bundles_post_ra>
// kernel: simple_nn_forward.1
= control target key start
LH: loop header
LB: loop body
LE: loop exit
PB: predicated region body
PF: predicated region fallthrough
CT: control target
= control target key end

     0   :  { %v159_v1 = vmov 0.0   ;;  %vm160_vm0 = vmmov 0   ;;  %s203_s0 = inlined_call_operand.vmem [shape: f32[8,32], index: 0, kind: input, shape index: {}]   ;;  %s204_s1 = inlined_call_operand.vmem [shape: f32[32,128], index: 1, kind: input, shape index: {}]   ;;  %s205_s2 = inlined_call_operand.vmem [shape: f32[1,128], index: 2, kind: input, shape index: {}]   ;;  %s206_s3 = inlined_call_operand.hbm [shape: f32[8,128], index: 3, kind: output, shape index: {}]  }
   0x1   :  { %v19_v0 = vld [vmem:[%s204_s1 + $0x18] sm:$0xff]  ;;  %123 = vmatprep.subr.mxu0 %v159_v1  ;;  %v18_v2 = vld [vmem:[%s204_s1 + $0x10] sm:$0xff]  ;;  %131 = vmatprep.mubr.msk.f32.mxu0 %vm160_vm0, %v159_v1 }
   0x2   :  { %124 = vmatpush3.msra.mxu0 %v19_v0 }
   0x3   :  { %8 = vsyncpa [#allocation3], 0  ;;  %125 = vmatprep.subr.mxu0 %v159_v1  ;;  %v17_v3 = vld [vmem:[%s204_s1 + $0x8] sm:$0xff]  ;;  %v16_v4 = vld [vmem:[%s204_s1] sm:$0xff]  ;;  %vm27_vm1 = vcmask 261120   ;;  %s161_s24 = smov [#allocation2]  }
   0x4   :  { %126 = vmatpush3.msra.mxu0 %v18_v2  ;;  %v15_v5 = vld [vmem:[%s203_s0] sm:$0xff]  ;;  %s108_s25 = sshll.u32 %s161_s24, 4  ;;  %s109_s25 = int_to_ptr.vmem [resolvable:$true] %s108_s25 }
   0x5   :  { %127 = vmatprep.subr.mxu0 %v159_v1  ;;  %v116_v6 = vld [vmem:[%s205_s2] ss:$0 sm:$0xff]  ;;  %s137_s1 = scalar_lea.vmem %s109_s25, 128  ;;  %p142_p1 = scmp.lt.s32.totalorder %s109_s25, %s109_s25 }
   0x6   :  { %128 = vmatpush3.msra.mxu0 %v17_v3  ;;  %p138_p0 = scmp.ne.s32.totalorder %s109_s25, %s137_s1  ;;  %p143_p2 = scmp.lt.s32.totalorder %s137_s1, %s137_s1 }
   0x7   :  { %129 = vmatprep.subr.mxu0 %v159_v1 }
   0x8   :  { %130 = vmatpush3.msra.mxu0 %v16_v4  ;;  %p144_p3 = por %p143_p2, %p142_p1 }
   0x9   :  { %132 = vmatmul.mubr.msk.f32.vlgmr.msra.gmra.mxu0 %vm27_vm1, %v15_v5 }
   0xa   :  { %p145_p4 = pnand %p144_p3, %p138_p0 }
  0xc9   :  { %v97_v7 = vpop.f32.mrf.mxu0 }
  0xca   :  { %v98_v8 = vadd.f32 %v116_v6, %v97_v7 }
  0xcb   :  { %v133_v9 = vpop.f32.mrf.mxu0 }
  0xcc   :  { %101 = vst [vmem:[#allocation2] sm:$0xff] %v98_v8 }
  0xcd   :  { %148 = shalt.err (!%p145_p4)
}
  0xce   :  { %111 = dma.vmem_to_hbm [thread:$0]  %s109_s25, 128, %s206_s3, [#allocation3]  }
  0xcf   :  { %157 = dma.done.wait [#allocation3], 128  }
  0xd0   :  { %158 = vsyncadd [#allocation3], 4294967168 }
  0xd1   :  { %115 = vsyncpa [#allocation3], 1 }

</bundles_post_ra>
